<compile_context>
chip_gen: v7x
topology: tpu7x:2x2x1
jax: 0.10.0
libtpu: 0.0.40
codegen_flags: <defaults>
</compile_context>

<pallas_src>
import functools

import jax
import jax.numpy as jnp
from jax.experimental import pallas as pl
from jax.experimental.pallas import tpu as pltpu

N_PAD = 128          # lane-padded width for every hidden layer
HIDDEN = (64, 32, 16, 8)


def _round_up(v, m):
    return ((v + m - 1) // m) * m


def dnp_kernel(x_ref, w0_ref, w_ref, b_ref, out_ref, *, out_dim):
    # Fused f32 -> bf16 cast on the VPU (free slot here), then layer 0 on MXU.
    x = x_ref[...].astype(jnp.bfloat16)
    h = jnp.dot(x, w0_ref[...], preferred_element_type=jnp.float32)
    h = jnp.maximum(h + b_ref[0:1, :], 0.0)
    # Layers 1..3: Linear + ReLU ; Layer 4: Linear only (all 128-lane padded).
    for i in range(4):
        h = jnp.dot(h.astype(jnp.bfloat16), w_ref[i],
                    preferred_element_type=jnp.float32)
        h = h + b_ref[8 * (i + 1):8 * (i + 1) + 1, :]
        if i < 3:
            h = jnp.maximum(h, 0.0)
    # Narrow (masked) store of only the real output columns.
    out_ref[...] = h[:, :out_dim].astype(out_ref.dtype)
    # TODO(synk): apply_dropout=True path (nn.Dropout after each ReLU) not
    # implemented; forward default is apply_dropout=False (identity).  If
    # needed, implement in-kernel with pltpu.prng_seed / prng_random_bits.


def dnp_forward(x, w0_packed, w_rest, bias_pack, out_dim, *, tm=1024):
    """x: [batch, input_dim] f32.  Returns [batch, out_dim] f32."""
    batch, d = x.shape
    n_pad = w0_packed.shape[-1]

    # Batch tile: multiple of 16 (bf16 sublane packing), capped so the grid
    # has >=2 steps (v7x megacore sharding + pipelining) whenever possible.
    tm = max(16, min(tm, _round_up(batch, 16)))
    tm = _round_up(tm, 16)
    if batch >= 32:
        tm = min(tm, _round_up(pl.cdiv(batch, 2), 16))

    padded_batch = pl.cdiv(batch, tm) * tm
    xp = x
    if padded_batch != batch:
        xp = jnp.pad(x, ((0, padded_batch - batch), (0, 0)))

    grid = (padded_batch // tm,)

    flops = 2 * padded_batch * (d * n_pad + w_rest.shape[0] * n_pad * n_pad)
    bytes_accessed = (xp.size * 4 + w0_packed.size * 2 + w_rest.size * 2
                      + bias_pack.size * 4 + padded_batch * out_dim * 4)

    out = pl.pallas_call(
        functools.partial(dnp_kernel, out_dim=out_dim),
        out_shape=jax.ShapeDtypeStruct((padded_batch, out_dim), jnp.float32),
        grid=grid,
        in_specs=[
            pl.BlockSpec((tm, d), lambda i: (i, 0)),                 # x tile (f32)
            pl.BlockSpec((d, n_pad), lambda i: (0, 0)),              # w0 (resident)
            pl.BlockSpec(w_rest.shape, lambda i: (0, 0, 0)),         # w1..4 (resident)
            pl.BlockSpec(bias_pack.shape, lambda i: (0, 0)),         # biases (resident)
        ],
        out_specs=pl.BlockSpec((tm, out_dim), lambda i: (i, 0)),     # narrow output
        compiler_params=pltpu.CompilerParams(
            dimension_semantics=("parallel",)),
        cost_estimate=pl.CostEstimate(
            flops=flops, transcendentals=0, bytes_accessed=bytes_accessed),
    )(xp, w0_packed, w_rest, bias_pack)

    return out[:batch] if padded_batch != batch else out


def init_dnp_params(key, input_dim, output_dim=1, *, zero_first_layer=True):
    """Faithful to the PyTorch module: layer-0 weight = 0 (constant_ init),
    everything else uniform(-1/sqrt(fan_in), +1/sqrt(fan_in))."""
    dims = [input_dim, *HIDDEN, output_dim]
    params = []
    for i in range(5):
        fan_in, fan_out = dims[i], dims[i + 1]
        key, kw, kb = jax.random.split(key, 3)
        bound = 1.0 / float(fan_in) ** 0.5
        if i == 0 and zero_first_layer:
            w = jnp.zeros((fan_in, fan_out), jnp.float32)
        else:
            w = jax.random.uniform(kw, (fan_in, fan_out), jnp.float32,
                                   minval=-bound, maxval=bound)
        b = jax.random.uniform(kb, (fan_out,), jnp.float32,
                               minval=-bound, maxval=bound)
        params.append((w, b))
    return params


def pack_params(params, n_pad=N_PAD):
    """Pack 5 (W [in,out], b [out]) into lane-padded slabs."""
    w0, _ = params[0]
    w0_packed = jnp.zeros((w0.shape[0], n_pad), jnp.float32)
    w0_packed = w0_packed.at[:, :w0.shape[1]].set(w0)

    w_rest = jnp.zeros((4, n_pad, n_pad), jnp.float32)
    for i, (w, _) in enumerate(params[1:]):
        w_rest = w_rest.at[i, :w.shape[0], :w.shape[1]].set(w)

    bias_pack = jnp.zeros((8 * 5, n_pad), jnp.float32)
    for i, (_, b) in enumerate(params):
        bias_pack = bias_pack.at[8 * i, :b.shape[0]].set(b)

    return (w0_packed.astype(jnp.bfloat16),
            w_rest.astype(jnp.bfloat16),
            bias_pack)


def dnp_reference_packed(x, w0_packed, w_rest, bias_pack):
    """Mirror of the kernel numerics (bf16 matmul inputs, f32 accumulate)."""
    h = (x.astype(jnp.bfloat16).astype(jnp.float32)
         @ w0_packed.astype(jnp.float32)) + bias_pack[0]
    h = jnp.maximum(h, 0.0)
    for i in range(4):
        h = (h.astype(jnp.bfloat16).astype(jnp.float32)
             @ w_rest[i].astype(jnp.float32)) + bias_pack[8 * (i + 1)]
        if i < 3:
            h = jnp.maximum(h, 0.0)
    return h


def dnp_reference_f32(x, params):
    """Plain f32 reference of the original module semantics."""
    h = x
    for i, (w, b) in enumerate(params):
        h = h @ w + b
        if i < len(params) - 1:
            h = jnp.maximum(h, 0.0)
    return h


if __name__ == "__main__":
    input_dim, output_dim, batch = 32, 1, 512

    key = jax.random.PRNGKey(0)
    key, kx, kp = jax.random.split(key, 3)
    x = jax.random.normal(kx, (batch, input_dim), jnp.float32)

    run = functools.partial(dnp_forward, out_dim=output_dim, tm=1024)

    for zero_w0 in (True, False):   # faithful init + a non-degenerate check
        params = init_dnp_params(kp, input_dim, output_dim,
                                 zero_first_layer=zero_w0)
        w0_packed, w_rest, bias_pack = pack_params(params)

        out = run(x, w0_packed, w_rest, bias_pack)
        out = jax.block_until_ready(out)
        assert out.shape == (batch, output_dim), out.shape

        ref_mirror = dnp_reference_packed(x, w0_packed, w_rest,
                                          bias_pack)[:, :output_dim]
        assert jnp.allclose(out, ref_mirror, atol=2e-3, rtol=2e-3), (
            "mismatch vs packed reference", zero_w0)

        ref_f32 = dnp_reference_f32(x, params)
        assert jnp.allclose(out, ref_f32, atol=5e-2, rtol=5e-2), (
            "mismatch vs f32 reference", zero_w0)

    print("KERNEL_OK")
</pallas_src>

<mosaic_0001>
module attributes {stable_mosaic.version = 11 : i64} {
  func.func @dnp_kernel(%arg0: i32, %arg1: memref<256x32xf32, #tpu.memory_space<vmem>>, %arg2: memref<32x128xbf16, #tpu.memory_space<vmem>>, %arg3: memref<4x128x128xbf16, #tpu.memory_space<vmem>>, %arg4: memref<40x128xf32, #tpu.memory_space<vmem>>, %arg5: memref<256x1xf32, #tpu.memory_space<vmem>>) attributes {dimension_semantics = [#tpu.dimension_semantics<parallel>], iteration_bounds = array<i64: 2>, scalar_prefetch = 0 : i64, scratch_operands = 0 : i64, tpu.core_type = #tpu.core_type<tc>, window_params = [{transform_indices = @transform_0, window_bounds = array<i64: 256, 32>}, {pipeline_mode = #tpu.pipeline_mode<synchronous>, transform_indices = @transform_1, window_bounds = array<i64: 32, 128>}, {pipeline_mode = #tpu.pipeline_mode<synchronous>, transform_indices = @transform_2, window_bounds = array<i64: 4, 128, 128>}, {pipeline_mode = #tpu.pipeline_mode<synchronous>, transform_indices = @transform_3, window_bounds = array<i64: 40, 128>}, {transform_indices = @transform_4, window_bounds = array<i64: 256, 1>}]} {
    %c0 = arith.constant 0 : index
    %c0_0 = arith.constant 0 : index
    %0 = vector.load %arg1[%c0, %c0_0] : memref<256x32xf32, #tpu.memory_space<vmem>>, vector<256x32xf32>
    %1 = arith.truncf %0 : vector<256x32xf32> to vector<256x32xbf16>
    %c0_1 = arith.constant 0 : index
    %c0_2 = arith.constant 0 : index
    %2 = vector.load %arg2[%c0_1, %c0_2] : memref<32x128xbf16, #tpu.memory_space<vmem>>, vector<32x128xbf16>
    %cst = arith.constant dense<0.000000e+00> : vector<256x128xf32>
    %3 = tpu.matmul %1, %2, %cst {dimension_numbers = #tpu.dot_dimension_numbers<[1], [0], [0], [1], [0, 0, 1, 1], [], []>} : vector<256x32xbf16>, vector<32x128xbf16>, vector<256x128xf32> -> vector<256x128xf32>
    %c0_3 = arith.constant 0 : index
    %c0_4 = arith.constant 0 : index
    %4 = vector.load %arg4[%c0_3, %c0_4] : memref<40x128xf32, #tpu.memory_space<vmem>>, vector<1x128xf32>
    %5 = vector.broadcast %4 : vector<1x128xf32> to vector<256x128xf32>
    %6 = arith.addf %3, %5 : vector<256x128xf32>
    %cst_5 = arith.constant 0.000000e+00 : f32
    %7 = vector.broadcast %cst_5 : f32 to vector<256x128xf32>
    %8 = arith.maximumf %6, %7 : vector<256x128xf32>
    %9 = arith.truncf %8 : vector<256x128xf32> to vector<256x128xbf16>
    %c0_6 = arith.constant 0 : index
    %c0_7 = arith.constant 0 : index
    %c0_8 = arith.constant 0 : index
    %10 = vector.load %arg3[%c0_6, %c0_7, %c0_8] : memref<4x128x128xbf16, #tpu.memory_space<vmem>>, vector<1x128x128xbf16>
    %11 = vector.shape_cast %10 : vector<1x128x128xbf16> to vector<128x128xbf16>
    %cst_9 = arith.constant dense<0.000000e+00> : vector<256x128xf32>
    %12 = tpu.matmul %9, %11, %cst_9 {dimension_numbers = #tpu.dot_dimension_numbers<[1], [0], [0], [1], [0, 0, 1, 1], [], []>} : vector<256x128xbf16>, vector<128x128xbf16>, vector<256x128xf32> -> vector<256x128xf32>
    %c8 = arith.constant 8 : index
    %c0_10 = arith.constant 0 : index
    %13 = vector.load %arg4[%c8, %c0_10] : memref<40x128xf32, #tpu.memory_space<vmem>>, vector<1x128xf32>
    %14 = vector.broadcast %13 : vector<1x128xf32> to vector<256x128xf32>
    %15 = arith.addf %12, %14 : vector<256x128xf32>
    %cst_11 = arith.constant 0.000000e+00 : f32
    %16 = vector.broadcast %cst_11 : f32 to vector<256x128xf32>
    %17 = arith.maximumf %15, %16 : vector<256x128xf32>
    %18 = arith.truncf %17 : vector<256x128xf32> to vector<256x128xbf16>
    %c1 = arith.constant 1 : index
    %c0_12 = arith.constant 0 : index
    %c0_13 = arith.constant 0 : index
    %19 = vector.load %arg3[%c1, %c0_12, %c0_13] : memref<4x128x128xbf16, #tpu.memory_space<vmem>>, vector<1x128x128xbf16>
    %20 = vector.shape_cast %19 : vector<1x128x128xbf16> to vector<128x128xbf16>
    %cst_14 = arith.constant dense<0.000000e+00> : vector<256x128xf32>
    %21 = tpu.matmul %18, %20, %cst_14 {dimension_numbers = #tpu.dot_dimension_numbers<[1], [0], [0], [1], [0, 0, 1, 1], [], []>} : vector<256x128xbf16>, vector<128x128xbf16>, vector<256x128xf32> -> vector<256x128xf32>
    %c16 = arith.constant 16 : index
    %c0_15 = arith.constant 0 : index
    %22 = vector.load %arg4[%c16, %c0_15] : memref<40x128xf32, #tpu.memory_space<vmem>>, vector<1x128xf32>
    %23 = vector.broadcast %22 : vector<1x128xf32> to vector<256x128xf32>
    %24 = arith.addf %21, %23 : vector<256x128xf32>
    %cst_16 = arith.constant 0.000000e+00 : f32
    %25 = vector.broadcast %cst_16 : f32 to vector<256x128xf32>
    %26 = arith.maximumf %24, %25 : vector<256x128xf32>
    %27 = arith.truncf %26 : vector<256x128xf32> to vector<256x128xbf16>
    %c2 = arith.constant 2 : index
    %c0_17 = arith.constant 0 : index
    %c0_18 = arith.constant 0 : index
    %28 = vector.load %arg3[%c2, %c0_17, %c0_18] : memref<4x128x128xbf16, #tpu.memory_space<vmem>>, vector<1x128x128xbf16>
    %29 = vector.shape_cast %28 : vector<1x128x128xbf16> to vector<128x128xbf16>
    %cst_19 = arith.constant dense<0.000000e+00> : vector<256x128xf32>
    %30 = tpu.matmul %27, %29, %cst_19 {dimension_numbers = #tpu.dot_dimension_numbers<[1], [0], [0], [1], [0, 0, 1, 1], [], []>} : vector<256x128xbf16>, vector<128x128xbf16>, vector<256x128xf32> -> vector<256x128xf32>
    %c24 = arith.constant 24 : index
    %c0_20 = arith.constant 0 : index
    %31 = vector.load %arg4[%c24, %c0_20] : memref<40x128xf32, #tpu.memory_space<vmem>>, vector<1x128xf32>
    %32 = vector.broadcast %31 : vector<1x128xf32> to vector<256x128xf32>
    %33 = arith.addf %30, %32 : vector<256x128xf32>
    %cst_21 = arith.constant 0.000000e+00 : f32
    %34 = vector.broadcast %cst_21 : f32 to vector<256x128xf32>
    %35 = arith.maximumf %33, %34 : vector<256x128xf32>
    %36 = arith.truncf %35 : vector<256x128xf32> to vector<256x128xbf16>
    %c3 = arith.constant 3 : index
    %c0_22 = arith.constant 0 : index
    %c0_23 = arith.constant 0 : index
    %37 = vector.load %arg3[%c3, %c0_22, %c0_23] : memref<4x128x128xbf16, #tpu.memory_space<vmem>>, vector<1x128x128xbf16>
    %38 = vector.shape_cast %37 : vector<1x128x128xbf16> to vector<128x128xbf16>
    %cst_24 = arith.constant dense<0.000000e+00> : vector<256x128xf32>
    %39 = tpu.matmul %36, %38, %cst_24 {dimension_numbers = #tpu.dot_dimension_numbers<[1], [0], [0], [1], [0, 0, 1, 1], [], []>} : vector<256x128xbf16>, vector<128x128xbf16>, vector<256x128xf32> -> vector<256x128xf32>
    %c32 = arith.constant 32 : index
    %c0_25 = arith.constant 0 : index
    %40 = vector.load %arg4[%c32, %c0_25] : memref<40x128xf32, #tpu.memory_space<vmem>>, vector<1x128xf32>
    %41 = vector.broadcast %40 : vector<1x128xf32> to vector<256x128xf32>
    %42 = arith.addf %39, %41 : vector<256x128xf32>
    %43 = vector.extract_strided_slice %42 {offsets = [0, 0], sizes = [256, 1], strides = [1, 1]} : vector<256x128xf32> to vector<256x1xf32>
    %c0_26 = arith.constant 0 : index
    %c0_27 = arith.constant 0 : index
    %44 = vector.load %arg5[%c0_26, %c0_27] : memref<256x1xf32, #tpu.memory_space<vmem>>, vector<256x1xf32>
    tpu.vector_store %arg5[%c0_26, %c0_27], %43 {strides = array<i32>} : memref<256x1xf32, #tpu.memory_space<vmem>>, vector<256x1xf32>,
    return
  }
  func.func @transform_0(%arg0: i32) -> (i32, i32) {
    %c0_i32 = arith.constant 0 : i32
    %c0_i32_0 = arith.constant 0 : i32
    return %arg0, %c0_i32 : i32, i32
  }
  func.func @transform_1(%arg0: i32) -> (i32, i32) {
    %c0_i32 = arith.constant 0 : i32
    %c0_i32_0 = arith.constant 0 : i32
    %c0_i32_1 = arith.constant 0 : i32
    return %c0_i32, %c0_i32_0 : i32, i32
  }
  func.func @transform_2(%arg0: i32) -> (i32, i32, i32) {
    %c0_i32 = arith.constant 0 : i32
    %c0_i32_0 = arith.constant 0 : i32
    %c0_i32_1 = arith.constant 0 : i32
    %c0_i32_2 = arith.constant 0 : i32
    return %c0_i32, %c0_i32_0, %c0_i32_1 : i32, i32, i32
  }
  func.func @transform_3(%arg0: i32) -> (i32, i32) {
    %c0_i32 = arith.constant 0 : i32
    %c0_i32_0 = arith.constant 0 : i32
    %c0_i32_1 = arith.constant 0 : i32
    return %c0_i32, %c0_i32_0 : i32, i32
  }
  func.func @transform_4(%arg0: i32) -> (i32, i32) {
    %c0_i32 = arith.constant 0 : i32
    %c0_i32_0 = arith.constant 0 : i32
    return %arg0, %c0_i32 : i32, i32
  }
}

</mosaic_0001>

<bundles_post_ra>
// kernel: tpu_custom_call.1
= control target key start
LH: loop header
LB: loop body
LE: loop exit
PB: predicated region body
PF: predicated region fallthrough
CT: control target
= control target key end

     0   :  { %s2220_s15 = smov 0   ;;  %s2653_s0 = inlined_call_operand.vmem [shape: f32[512,32], index: 0, kind: input, shape index: {}]   ;;  %s2654_s1 = inlined_call_operand.vmem [shape: bf16[32,128], index: 1, kind: input, shape index: {}]   ;;  %s2655_s2 = inlined_call_operand.vmem [shape: bf16[4,128,128], index: 2, kind: input, shape index: {}]   ;;  %s2656_s3 = inlined_call_operand.vmem [shape: f32[40,128], index: 3, kind: input, shape index: {}]   ;;  %s2657_s4 = inlined_call_operand.vmem [shape: f32[512,1], index: 4, kind: output, shape index: {}]  }
   0x1 LB: > { %s1685_s16 = sadd.s32 4294967295, %s2193_s15   ;;  %p1689_p0 = scmp.ge.s32.totalorder %s2193_s15, 1  ;;  %s2193_s15 = sphi %s2220_s15, %s14_s15  }
   0x2   : > { %p163_p1 = scmp.lt.s32.totalorder %s2193_s15, 3 }
   0x4   : > { %p164_p2 = pnand %p1689_p0, %p163_p1 }
   0x5   : > { %v2153_v0 = vld [vmem:[%s2654_s1] sm:$0xff] (!%p164_p2)   ;;  %s1690_s19 = sshll.u32 (!%p164_p2), %s1685_s16, 5  ;;  %v2154_v1 = vld [vmem:[%s2654_s1 + $0x8] sm:$0xff] (!%p164_p2)   ;;  %vm271_vm0 = vcmask (!%p164_p2), 261120   ;;  %v2157_v29 = vld [vmem:[%s2655_s2 + $0x10] sm:$0xff] (!%p164_p2)   ;;  %vm1596_vm1 = vcmask (!%p164_p2), 7168  }
   0x6   : > { %167 = sbr.rel (%p164_p2) target bundleno = 1182 (0x49e), region = 36  ;;  %p190_p3 = scmp.lt.s32.totalorder (!%p164_p2), %s1690_s19, 63  ;;  %1913 = vmatprep.subr.bf16.mxu0 (!%p164_p2), %v2153_v0  ;;  %2141 = vmatprep.subr.bf16.mxu1 (!%p164_p2), %v2153_v0  ;;  %v2155_v2 = vld [vmem:[%s2655_s2] sm:$0xff] (!%p164_p2)   ;;  %v2156_v24 = vld [vmem:[%s2655_s2 + $0x8] sm:$0xff] (!%p164_p2)   ;;  %v2158_v38 = vld [vmem:[%s2655_s2 + $0x18] sm:$0xff] (!%p164_p2)  }
   0x7   : > { %1914 = vmatpush3.bf16.msra.mxu0 (!%p164_p2), %v2153_v0  ;;  %2143 = vmatpush3.bf16.msra.mxu1 (!%p164_p2), %v2153_v0  ;;  %v2159_v46 = vld [vmem:[%s2655_s2 + $0x20] sm:$0xff] (!%p164_p2)   ;;  %v2160_v50 = vld [vmem:[%s2655_s2 + $0x28] sm:$0xff] (!%p164_p2)   ;;  %v2161_v56 = vld [vmem:[%s2655_s2 + $0x30] sm:$0xff] (!%p164_p2)  }
   0x8   : > { %1915 = vmatprep.subr.bf16.mxu0 (!%p164_p2), %v2154_v1  ;;  %2142 = vmatprep.subr.bf16.mxu1 (!%p164_p2), %v2154_v1  ;;  %v2162_v57 = vld [vmem:[%s2655_s2 + $0x38] sm:$0xff] (!%p164_p2)   ;;  %v2163_v58 = vld [vmem:[%s2655_s2 + $0x40] sm:$0xff] (!%p164_p2)   ;;  %v2164_v59 = vld [vmem:[%s2655_s2 + $0x48] sm:$0xff] (!%p164_p2)  }
   0x9   : > { %v2165_v60 = vld [vmem:[%s2655_s2 + $0x50] sm:$0xff] (!%p164_p2)   ;;  %v2166_v61 = vld [vmem:[%s2655_s2 + $0x58] sm:$0xff] (!%p164_p2)   ;;  %v2167_v62 = vld [vmem:[%s2655_s2 + $0x60] sm:$0xff] (!%p164_p2)  }
   0xa   : > { %v2168_v63 = vld [vmem:[%s2655_s2 + $0x68] sm:$0xff] (!%p164_p2)   ;;  %v2337_v0 = vld [vmem:[%s2656_s3] ss:$0 sm:$0xff] (!%p164_p2) }
   0xb   : > { %1916 = vmatpush3.bf16.msra.mxu0 (!%p164_p2), %v2154_v1  ;;  %2144 = vmatpush3.bf16.msra.mxu1 (!%p164_p2), %v2154_v1 }
   0xc   : > { %1949 = vmatprep.subr.bf16.mxu1 (!%p164_p2), %v2155_v2  ;;  %1997 = vmatprep.subr.bf16.mxu0 (!%p164_p2), %v2163_v58 }
   0xd   : > { %s2659_s19 = smov (!%p190_p3, %s1690_s19), 63 }
   0xe   : > { %s1691_s24 = sshll.u32 %s2659_s19, 3 }
   0xf   : > { %s2245_s27 = scalar_lea.vmem %s2653_s0, %s1691_s24  ;;  %s2552_s7 = scalar_lea.vmem %s2657_s4, %s1691_s24 }
  0x10   : > { %v202_v3 = vld [vmem:[%s2245_s27] sm:$0xff]  ;;  %v203_v4 = vld [vmem:[%s2245_s27 + $0x8] sm:$0xff]  ;;  %v204_v5 = vld [vmem:[%s2245_s27 + $0x10] sm:$0xff] }
  0x11   : > { %v234_v6 = vpack.c.bf16 %v203_v4, %v202_v3  ;;  %v205_v7 = vld [vmem:[%s2245_s27 + $0x18] sm:$0xff]  ;;  %v206_v8 = vld [vmem:[%s2245_s27 + $0x20] sm:$0xff]  ;;  %v207_v9 = vld [vmem:[%s2245_s27 + $0x28] sm:$0xff] }
  0x12   : > { %v235_v10 = vpack.c.bf16 %v205_v7, %v204_v5  ;;  %v236_v11 = vpack.c.bf16 %v207_v9, %v206_v8  ;;  %v208_v12 = vld [vmem:[%s2245_s27 + $0x30] sm:$0xff]  ;;  %v209_v13 = vld [vmem:[%s2245_s27 + $0x38] sm:$0xff]  ;;  %v210_v14 = vld [vmem:[%s2245_s27 + $0x40] sm:$0xff] }
  0x13   : > { %1917 = vmatprep.mubr.msk.bf16.mxu0 %vm271_vm0, %v234_v6  ;;  %v211_v15 = vld [vmem:[%s2245_s27 + $0x48] sm:$0xff]  ;;  %v218_v16 = vld [vmem:[%s2245_s27 + $0x80] sm:$0xff]  ;;  %v220_v19 = vld [vmem:[%s2245_s27 + $0x90] sm:$0xff]  ;;  %v237_v25 = vpack.c.bf16 %v209_v13, %v208_v12 }
  0x14   : > { %1918 = vmatmul.mubr.msk.bf16.vlgmr.msra.gmra.mrb[0].mxu0 %vm271_vm0, %v235_v10  ;;  %v219_v17 = vld [vmem:[%s2245_s27 + $0x88] sm:$0xff]  ;;  %v221_v20 = vld [vmem:[%s2245_s27 + $0x98] sm:$0xff]  ;;  %v222_v21 = vld [vmem:[%s2245_s27 + $0xa0] sm:$0xff]  ;;  %v238_v27 = vpack.c.bf16 %v211_v15, %v210_v14 }
  0x15   : > { %1921 = vmatprep.mubr.msk.bf16.mxu0 %vm271_vm0, %v236_v11  ;;  %v242_v18 = vpack.c.bf16 %v219_v17, %v218_v16  ;;  %v243_v22 = vpack.c.bf16 %v221_v20, %v220_v19  ;;  %v223_v23 = vld [vmem:[%s2245_s27 + $0xa8] sm:$0xff]  ;;  %v224_v28 = vld [vmem:[%s2245_s27 + $0xb0] sm:$0xff]  ;;  %v225_v30 = vld [vmem:[%s2245_s27 + $0xb8] sm:$0xff]  ;;  %1998 = vmatpush3.bf16.msra.mxu0 %v2163_v58 }
  0x16   : > { %v244_v26 = vpack.c.bf16 %v223_v23, %v222_v21  ;;  %v226_v31 = vld [vmem:[%s2245_s27 + $0xc0] sm:$0xff]  ;;  %v212_v32 = vld [vmem:[%s2245_s27 + $0x50] sm:$0xff]  ;;  %v213_v33 = vld [vmem:[%s2245_s27 + $0x58] sm:$0xff]  ;;  %v245_v37 = vpack.c.bf16 %v225_v30, %v224_v28  ;;  %1999 = vmatprep.subr.bf16.mxu0 %v2164_v59 }
  0x17   : > { %1933 = vmatprep.mubr.msk.bf16.mxu1 %vm271_vm0, %v242_v18  ;;  %v227_v34 = vld [vmem:[%s2245_s27 + $0xc8] sm:$0xff]  ;;  %v214_v35 = vld [vmem:[%s2245_s27 + $0x60] sm:$0xff]  ;;  %v239_v40 = vpack.c.bf16 %v213_v33, %v212_v32  ;;  %v228_v41 = vld [vmem:[%s2245_s27 + $0xd0] sm:$0xff] }
  0x18   : > { %1934 = vmatmul.mubr.msk.bf16.vlgmr.msra.gmra.mrb[0].mxu1 %vm271_vm0, %v243_v22  ;;  %v215_v36 = vld [vmem:[%s2245_s27 + $0x68] sm:$0xff]  ;;  %v246_v39 = vpack.c.bf16 %v227_v34, %v226_v31  ;;  %v229_v42 = vld [vmem:[%s2245_s27 + $0xd8] sm:$0xff]  ;;  %v230_v44 = vld [vmem:[%s2245_s27 + $0xe0] sm:$0xff] }
  0x19   : > { %1937 = vmatprep.mubr.msk.bf16.mxu1 %vm271_vm0, %v244_v26  ;;  %1950 = vmatpush3.bf16.msra.mxu1 %v2155_v2  ;;  %v240_v43 = vpack.c.bf16 %v215_v36, %v214_v35  ;;  %v231_v45 = vld [vmem:[%s2245_s27 + $0xe8] sm:$0xff]  ;;  %v216_v47 = vld [vmem:[%s2245_s27 + $0x70] sm:$0xff]  ;;  %v217_v48 = vld [vmem:[%s2245_s27 + $0x78] sm:$0xff]  ;;  %v247_v49 = vpack.c.bf16 %v229_v42, %v228_v41 }
  0x1a   : > { %1951 = vmatprep.subr.bf16.mxu1 %v2156_v24  ;;  %v248_v51 = vpack.c.bf16 %v231_v45, %v230_v44  ;;  %v241_v52 = vpack.c.bf16 %v217_v48, %v216_v47  ;;  %v232_v53 = vld [vmem:[%s2245_s27 + $0xf0] sm:$0xff]  ;;  %v233_v54 = vld [vmem:[%s2245_s27 + $0xf8] sm:$0xff]  ;;  %2000 = vmatpush3.bf16.msra.mxu0 %v2164_v59 }
  0x1b   : > { %v249_v55 = vpack.c.bf16 %v233_v54, %v232_v53  ;;  %2001 = vmatprep.subr.bf16.mxu0 %v2165_v60 }
  0x1c   : > { %1922 = vmatmul.mubr.msk.bf16.gmra.mrb[4].mxu0 %vm271_vm0, %v237_v25 }
  0x1d   : > { %1925 = vmatprep.mubr.msk.bf16.mxu0 %vm271_vm0, %v238_v27  ;;  %1952 = vmatpush3.bf16.msra.mxu1 %v2156_v24 }
  0x1e   : > { %1953 = vmatprep.subr.bf16.mxu1 %v2157_v29  ;;  %2002 = vmatpush3.bf16.msra.mxu0 %v2165_v60 }
  0x1f   : > { %2003 = vmatprep.subr.bf16.mxu0 %v2166_v61 }
  0x20   : > { %1938 = vmatmul.mubr.msk.bf16.gmra.mrb[4].mxu1 %vm271_vm0, %v245_v37 }
  0x21   : > { %1941 = vmatprep.mubr.msk.bf16.mxu1 %vm271_vm0, %v246_v39  ;;  %1954 = vmatpush3.bf16.msra.mxu1 %v2157_v29 }
  0x22   : > { %1955 = vmatprep.subr.bf16.mxu1 %v2158_v38  ;;  %2004 = vmatpush3.bf16.msra.mxu0 %v2166_v61 }
  0x23   : > { %2005 = vmatprep.subr.bf16.mxu0 %v2167_v62 }
  0x24   : > { %1926 = vmatmul.mubr.msk.bf16.gmra.mrb[8].mxu0 %vm271_vm0, %v239_v40 }
  0x25   : > { %1929 = vmatprep.mubr.msk.bf16.mxu0 %vm271_vm0, %v240_v43  ;;  %1956 = vmatpush3.bf16.msra.mxu1 %v2158_v38 }
  0x26   : > { %1957 = vmatprep.subr.bf16.mxu1 %v2159_v46  ;;  %2006 = vmatpush3.bf16.msra.mxu0 %v2167_v62 }
  0x27   : > { %2007 = vmatprep.subr.bf16.mxu0 %v2168_v63 }
  0x28   : > { %1942 = vmatmul.mubr.msk.bf16.gmra.mrb[8].mxu1 %vm271_vm0, %v247_v49 }
  0x29   : > { %1945 = vmatprep.mubr.msk.bf16.mxu1 %vm271_vm0, %v248_v51  ;;  %1958 = vmatpush3.bf16.msra.mxu1 %v2159_v46 }
  0x2a   : > { %1959 = vmatprep.subr.bf16.mxu1 %v2160_v50  ;;  %2008 = vmatpush3.bf16.msra.mxu0 %v2168_v63 }
  0x2c   : > { %1930 = vmatmul.mubr.msk.bf16.gmra.mrb[12].mxu0 %vm271_vm0, %v241_v52 }
  0x2d   : > { %1960 = vmatpush3.bf16.msra.mxu1 %v2160_v50 }
  0x2e   : > { %1961 = vmatprep.subr.bf16.mxu1 %v2161_v56 }
  0x30   : > { %1946 = vmatmul.mubr.msk.bf16.gmra.mrb[12].mxu1 %vm271_vm0, %v249_v55 }
  0x31   : > { %1962 = vmatpush3.bf16.msra.mxu1 %v2161_v56 }
  0x32   : > { %1963 = vmatprep.subr.bf16.mxu1 %v2162_v57 }
  0x35   : > { %1964 = vmatpush3.bf16.msra.mxu1 %v2162_v57 }
  0xe7   : > { %v1919_v1 = vpop.f32.mrb[0].mxu0 }
  0xe8   : > { %v363_v2 = vadd.f32 %v1919_v1, %v2337_v0  ;;  %v354_v3 = vpop.f32.mrb[1].mxu0 }
  0xe9   : > { %v355_v4 = vadd.f32 %v2337_v0, %v354_v3  ;;  %v1920_v5 = vpop.f32.mrb[2].mxu0 }
  0xea   : > { %v366_v6 = vadd.f32 %v1920_v5, %v2337_v0  ;;  %v357_v7 = vpop.f32.mrb[3].mxu0  ;;  %v483_v9 = vmax.f32 %v363_v2, 0.0 }
  0xeb   : > { %v358_v8 = vadd.f32 %v2337_v0, %v357_v7  ;;  %v1935_v11 = vpop.f32.mrb[0].mxu1  ;;  %v481_v12 = vmax.f32 %v355_v4, 0.0 }
  0xec   : > { %v484_v10 = vmax.f32 %v366_v6, 0.0  ;;  %v427_v14 = vadd.f32 %v1935_v11, %v2337_v0  ;;  %v418_v15 = vpop.f32.mrb[1].mxu1 }
  0xed   : > { %v482_v13 = vmax.f32 %v358_v8, 0.0  ;;  %v419_v17 = vadd.f32 %v2337_v0, %v418_v15  ;;  %v1936_v18 = vpop.f32.mrb[2].mxu1 }
  0xee   : > { %v514_v16 = vpack.c.bf16 %v484_v10, %v483_v9  ;;  %v499_v21 = vmax.f32 %v427_v14, 0.0  ;;  %v430_v22 = vadd.f32 %v1936_v18, %v2337_v0  ;;  %v421_v23 = vpop.f32.mrb[3].mxu1 }
  0xef   : > { %v513_v19 = vpack.c.bf16 %v482_v13, %v481_v12  ;;  %v1923_v20 = vpop.f32.mrb[4].mxu0  ;;  %v497_v26 = vmax.f32 %v419_v17, 0.0  ;;  %v422_v27 = vadd.f32 %v2337_v0, %v421_v23 }
  0xf0   : > { %v379_v24 = vadd.f32 %v1923_v20, %v2337_v0  ;;  %v370_v25 = vpop.f32.mrb[5].mxu0  ;;  %v500_v30 = vmax.f32 %v430_v22, 0.0 }
  0xf1   : > { %v371_v28 = vadd.f32 %v2337_v0, %v370_v25  ;;  %v1924_v29 = vpop.f32.mrb[6].mxu0  ;;  %1965 = vmatprep.mubr.bf16.mxu1 %v513_v19  ;;  %v498_v33 = vmax.f32 %v422_v27, 0.0 }
  0xf2   : > { %v382_v31 = vadd.f32 %v1924_v29, %v2337_v0  ;;  %v373_v32 = vpop.f32.mrb[7].mxu0  ;;  %1966 = vmatmul.mubr.bf16.vlgmr.msra.gmra.mrb[16].mxu1 %v514_v16  ;;  %v2351_v35 = vpack.c.bf16 %v500_v30, %v499_v21  ;;  %v487_v36 = vmax.f32 %v379_v24, 0.0 }
  0xf3   : > { %v374_v34 = vadd.f32 %v2337_v0, %v373_v32  ;;  %v2353_v38 = vpack.c.bf16 %v498_v33, %v497_v26  ;;  %v1939_v39 = vpop.f32.mrb[4].mxu1  ;;  %v485_v40 = vmax.f32 %v371_v28, 0.0 }
  0xf4   : > { %v488_v37 = vmax.f32 %v382_v31, 0.0  ;;  %v443_v42 = vadd.f32 %v1939_v39, %v2337_v0  ;;  %v434_v43 = vpop.f32.mrb[5].mxu1 }
  0xf5   : > { %v486_v41 = vmax.f32 %v374_v34, 0.0  ;;  %v435_v45 = vadd.f32 %v2337_v0, %v434_v43  ;;  %v1940_v46 = vpop.f32.mrb[6].mxu1 }
  0xf6   : > { %v516_v44 = vpack.c.bf16 %v488_v37, %v487_v36  ;;  %v503_v49 = vmax.f32 %v443_v42, 0.0  ;;  %v446_v50 = vadd.f32 %v1940_v46, %v2337_v0  ;;  %v437_v51 = vpop.f32.mrb[7].mxu1 }
  0xf7   : > { %v515_v47 = vpack.c.bf16 %v486_v41, %v485_v40  ;;  %v1927_v48 = vpop.f32.mrb[8].mxu0  ;;  %v501_v54 = vmax.f32 %v435_v45, 0.0  ;;  %v438_v55 = vadd.f32 %v2337_v0, %v437_v51 }
  0xf8   : > { %v395_v52 = vadd.f32 %v1927_v48, %v2337_v0  ;;  %v386_v53 = vpop.f32.mrb[9].mxu0  ;;  %v504_v58 = vmax.f32 %v446_v50, 0.0 }
  0xf9   : > { %v387_v56 = vadd.f32 %v2337_v0, %v386_v53  ;;  %v1928_v57 = vpop.f32.mrb[10].mxu0  ;;  %1969 = vmatprep.mubr.bf16.mxu1 %v515_v47  ;;  %v502_v61 = vmax.f32 %v438_v55, 0.0  ;;  %v2173_v53 = vld [vmem:[%s2655_s2 + $0x90] sm:$0xff]   ;;  %v2175_v55 = vld [vmem:[%s2655_s2 + $0xa0] sm:$0xff]  }
  0xfa   : > { %v398_v59 = vadd.f32 %v1928_v57, %v2337_v0  ;;  %v389_v60 = vpop.f32.mrb[11].mxu0  ;;  %1970 = vmatmul.mubr.bf16.gmra.mrb[20].mxu1 %v516_v44  ;;  %v524_v63 = vpack.c.bf16 %v504_v58, %v503_v49  ;;  %v491_v1 = vmax.f32 %v395_v52, 0.0  ;;  %v2172_v52 = vld [vmem:[%s2655_s2 + $0x88] sm:$0xff]   ;;  %v2177_v57 = vld [vmem:[%s2655_s2 + $0xb0] sm:$0xff]  }
  0xfb   : > { %v390_v62 = vadd.f32 %v2337_v0, %v389_v60  ;;  %v523_v3 = vpack.c.bf16 %v502_v61, %v501_v54  ;;  %v1943_v4 = vpop.f32.mrb[8].mxu1  ;;  %v489_v5 = vmax.f32 %v387_v56, 0.0  ;;  %v2174_v54 = vld [vmem:[%s2655_s2 + $0x98] sm:$0xff]   ;;  %v2176_v56 = vld [vmem:[%s2655_s2 + $0xa8] sm:$0xff]  }
  0xfc   : > { %v492_v2 = vmax.f32 %v398_v59, 0.0  ;;  %v459_v7 = vadd.f32 %v1943_v4, %v2337_v0  ;;  %v450_v8 = vpop.f32.mrb[9].mxu1  ;;  %v2407_v58 = vld [vmem:[%s2656_s3 + $0x8] ss:$0 sm:$0xff] }
  0xfd   : > { %v490_v6 = vmax.f32 %v390_v62, 0.0  ;;  %v451_v10 = vadd.f32 %v2337_v0, %v450_v8  ;;  %v1944_v11 = vpop.f32.mrb[10].mxu1 }
  0xfe   : > { %v518_v9 = vpack.c.bf16 %v492_v2, %v491_v1  ;;  %v507_v14 = vmax.f32 %v459_v7, 0.0  ;;  %v462_v15 = vadd.f32 %v1944_v11, %v2337_v0  ;;  %v453_v16 = vpop.f32.mrb[11].mxu1 }
  0xff   : > { %v517_v12 = vpack.c.bf16 %v490_v6, %v489_v5  ;;  %v1931_v13 = vpop.f32.mrb[12].mxu0  ;;  %v505_v19 = vmax.f32 %v451_v10, 0.0  ;;  %v454_v20 = vadd.f32 %v2337_v0, %v453_v16 }
 0x100   : > { %v411_v17 = vadd.f32 %v1931_v13, %v2337_v0  ;;  %v402_v18 = vpop.f32.mrb[13].mxu0  ;;  %v508_v23 = vmax.f32 %v462_v15, 0.0 }
 0x101   : > { %v403_v21 = vadd.f32 %v2337_v0, %v402_v18  ;;  %v1932_v22 = vpop.f32.mrb[14].mxu0  ;;  %1973 = vmatprep.mubr.bf16.mxu1 %v517_v12  ;;  %v506_v26 = vmax.f32 %v454_v20, 0.0 }
 0x102   : > { %v414_v24 = vadd.f32 %v1932_v22, %v2337_v0  ;;  %v405_v25 = vpop.f32.mrb[15].mxu0  ;;  %1974 = vmatmul.mubr.bf16.gmra.mrb[24].mxu1 %v518_v9  ;;  %v526_v28 = vpack.c.bf16 %v508_v23, %v507_v14  ;;  %v495_v29 = vmax.f32 %v411_v17, 0.0 }
 0x103   : > { %v406_v27 = vadd.f32 %v2337_v0, %v405_v25  ;;  %v525_v31 = vpack.c.bf16 %v506_v26, %v505_v19  ;;  %v1947_v32 = vpop.f32.mrb[12].mxu1  ;;  %v493_v33 = vmax.f32 %v403_v21, 0.0 }
 0x104   : > { %v496_v30 = vmax.f32 %v414_v24, 0.0  ;;  %v475_v36 = vadd.f32 %v1947_v32, %v2337_v0  ;;  %v466_v37 = vpop.f32.mrb[13].mxu1 }
 0x105   : > { %v494_v34 = vmax.f32 %v406_v27, 0.0  ;;  %v467_v40 = vadd.f32 %v2337_v0, %v466_v37  ;;  %v1948_v41 = vpop.f32.mrb[14].mxu1 }
 0x106   : > { %v520_v39 = vpack.c.bf16 %v496_v30, %v495_v29  ;;  %v511_v43 = vmax.f32 %v475_v36, 0.0  ;;  %v478_v44 = vadd.f32 %v1948_v41, %v2337_v0  ;;  %v469_v45 = vpop.f32.mrb[15].mxu1 }
 0x107   : > { %v519_v42 = vpack.c.bf16 %v494_v34, %v493_v33  ;;  %v509_v46 = vmax.f32 %v467_v40, 0.0  ;;  %v470_v47 = vadd.f32 %v2337_v0, %v469_v45  ;;  %v2169_v0 = vld [vmem:[%s2655_s2 + $0x70] sm:$0xff]  }
 0x108   : > { %v512_v48 = vmax.f32 %v478_v44, 0.0  ;;  %2009 = vmatprep.subr.bf16.mxu0 %v2169_v0 }
 0x109   : > { %1977 = vmatprep.mubr.bf16.mxu1 %v519_v42  ;;  %v510_v49 = vmax.f32 %v470_v47, 0.0  ;;  %2010 = vmatpush3.bf16.msra.mxu0 %v2169_v0 }
 0x10a   : > { %1978 = vmatmul.mubr.bf16.gmra.mrb[28].mxu1 %v520_v39  ;;  %v528_v50 = vpack.c.bf16 %v512_v48, %v511_v43 }
 0x10b   : > { %1981 = vmatprep.mubr.bf16.mxu1 %v2353_v38  ;;  %v527_v51 = vpack.c.bf16 %v510_v49, %v509_v46  ;;  %v2170_v38 = vld [vmem:[%s2655_s2 + $0x78] sm:$0xff]  }
 0x10c   : > { %2011 = vmatprep.subr.bf16.mxu0 %v2170_v38 }
 0x10d   : > { %2012 = vmatpush3.bf16.msra.mxu0 %v2170_v38 }
 0x112   : > { %1982 = vmatmul.mubr.bf16.gmra.mrb[32].mxu1 %v2351_v35  ;;  %v2171_v35 = vld [vmem:[%s2655_s2 + $0x80] sm:$0xff]  }
 0x113   : > { %1985 = vmatprep.mubr.bf16.mxu1 %v523_v3  ;;  %2045 = vmatprep.subr.bf16.mxu1 %v2171_v35 }
 0x114   : > { %2046 = vmatpush3.bf16.msra.mxu1 %v2171_v35 }
 0x115   : > { %2047 = vmatprep.subr.bf16.mxu1 %v2172_v52 }
 0x118   : > { %2048 = vmatpush3.bf16.msra.mxu1 %v2172_v52 }
 0x119   : > { %2049 = vmatprep.subr.bf16.mxu1 %v2173_v53 }
 0x11a   : > { %1986 = vmatmul.mubr.bf16.gmra.mrb[36].mxu1 %v524_v63 }
 0x11b   : > { %1989 = vmatprep.mubr.bf16.mxu1 %v525_v31 }
 0x11c   : > { %2050 = vmatpush3.bf16.msra.mxu1 %v2173_v53 }
 0x11d   : > { %2051 = vmatprep.subr.bf16.mxu1 %v2174_v54 }
 0x120   : > { %2052 = vmatpush3.bf16.msra.mxu1 %v2174_v54 }
 0x121   : > { %2053 = vmatprep.subr.bf16.mxu1 %v2175_v55 }
 0x122   : > { %1990 = vmatmul.mubr.bf16.gmra.mrb[40].mxu1 %v526_v28 }
 0x123   : > { %1993 = vmatprep.mubr.bf16.mxu1 %v527_v51 }
 0x124   : > { %2054 = vmatpush3.bf16.msra.mxu1 %v2175_v55 }
 0x125   : > { %2055 = vmatprep.subr.bf16.mxu1 %v2176_v56 }
 0x128   : > { %2056 = vmatpush3.bf16.msra.mxu1 %v2176_v56 }
 0x129   : > { %2057 = vmatprep.subr.bf16.mxu1 %v2177_v57 }
 0x12a   : > { %1994 = vmatmul.mubr.bf16.gmra.mrb[44].mxu1 %v528_v50 }
 0x12c   : > { %2058 = vmatpush3.bf16.msra.mxu1 %v2177_v57 }
 0x1c5   : > { %v1967_v59 = vpop.f32.mrb[16].mxu1 }
 0x1c6   : > { %v641_v60 = vadd.f32 %v1967_v59, %v2407_v58  ;;  %v632_v61 = vpop.f32.mrb[17].mxu1 }
 0x1c7   : > { %v633_v62 = vadd.f32 %v2407_v58, %v632_v61  ;;  %v1968_v63 = vpop.f32.mrb[18].mxu1 }
 0x1c8   : > { %v644_v1 = vadd.f32 %v1968_v63, %v2407_v58  ;;  %v635_v2 = vpop.f32.mrb[19].mxu1  ;;  %v761_v4 = vmax.f32 %v641_v60, 0.0 }
 0x1c9   : > { %v636_v3 = vadd.f32 %v2407_v58, %v635_v2  ;;  %v759_v6 = vmax.f32 %v633_v62, 0.0 }
 0x1ca   : > { %v762_v5 = vmax.f32 %v644_v1, 0.0 }
 0x1cb   : > { %v760_v7 = vmax.f32 %v636_v3, 0.0 }
 0x1cc   : > { %v792_v8 = vpack.c.bf16 %v762_v5, %v761_v4 }
 0x1cd   : > { %v791_v9 = vpack.c.bf16 %v760_v7, %v759_v6  ;;  %v1971_v10 = vpop.f32.mrb[20].mxu1 }
 0x1ce   : > { %v657_v11 = vadd.f32 %v1971_v10, %v2407_v58  ;;  %v648_v12 = vpop.f32.mrb[21].mxu1 }
 0x1cf   : > { %v649_v13 = vadd.f32 %v2407_v58, %v648_v12  ;;  %v1972_v14 = vpop.f32.mrb[22].mxu1  ;;  %2013 = vmatprep.mubr.bf16.mxu0 %v791_v9 }
 0x1d0   : > { %v660_v15 = vadd.f32 %v1972_v14, %v2407_v58  ;;  %v651_v16 = vpop.f32.mrb[23].mxu1  ;;  %2014 = vmatmul.mubr.bf16.vlgmr.msra.gmra.mrb[16].mxu0 %v792_v8  ;;  %v765_v18 = vmax.f32 %v657_v11, 0.0 }
 0x1d1   : > { %v652_v17 = vadd.f32 %v2407_v58, %v651_v16  ;;  %v763_v20 = vmax.f32 %v649_v13, 0.0 }
 0x1d2   : > { %v766_v19 = vmax.f32 %v660_v15, 0.0 }
 0x1d3   : > { %v764_v21 = vmax.f32 %v652_v17, 0.0 }
 0x1d4   : > { %v794_v22 = vpack.c.bf16 %v766_v19, %v765_v18 }
 0x1d5   : > { %v793_v23 = vpack.c.bf16 %v764_v21, %v763_v20  ;;  %v1975_v24 = vpop.f32.mrb[24].mxu1 }
 0x1d6   : > { %v673_v25 = vadd.f32 %v1975_v24, %v2407_v58  ;;  %v664_v26 = vpop.f32.mrb[25].mxu1 }
 0x1d7   : > { %v665_v27 = vadd.f32 %v2407_v58, %v664_v26  ;;  %v1976_v28 = vpop.f32.mrb[26].mxu1  ;;  %2017 = vmatprep.mubr.bf16.mxu0 %v793_v23 }
 0x1d8   : > { %v676_v29 = vadd.f32 %v1976_v28, %v2407_v58  ;;  %v667_v30 = vpop.f32.mrb[27].mxu1  ;;  %2018 = vmatmul.mubr.bf16.gmra.mrb[20].mxu0 %v794_v22  ;;  %v769_v32 = vmax.f32 %v673_v25, 0.0 }
 0x1d9   : > { %v668_v31 = vadd.f32 %v2407_v58, %v667_v30  ;;  %v767_v34 = vmax.f32 %v665_v27, 0.0 }
 0x1da   : > { %v770_v33 = vmax.f32 %v676_v29, 0.0 }
 0x1db   : > { %v768_v36 = vmax.f32 %v668_v31, 0.0 }
 0x1dc   : > { %v796_v37 = vpack.c.bf16 %v770_v33, %v769_v32 }
 0x1dd   : > { %v795_v39 = vpack.c.bf16 %v768_v36, %v767_v34  ;;  %v1979_v40 = vpop.f32.mrb[28].mxu1 }
 0x1de   : > { %v689_v41 = vadd.f32 %v1979_v40, %v2407_v58  ;;  %v680_v42 = vpop.f32.mrb[29].mxu1 }
 0x1df   : > { %v681_v43 = vadd.f32 %v2407_v58, %v680_v42  ;;  %v1980_v44 = vpop.f32.mrb[30].mxu1  ;;  %2021 = vmatprep.mubr.bf16.mxu0 %v795_v39 }
 0x1e0   : > { %v692_v45 = vadd.f32 %v1980_v44, %v2407_v58  ;;  %v683_v46 = vpop.f32.mrb[31].mxu1  ;;  %2022 = vmatmul.mubr.bf16.gmra.mrb[24].mxu0 %v796_v37  ;;  %v773_v48 = vmax.f32 %v689_v41, 0.0 }
 0x1e1   : > { %v684_v47 = vadd.f32 %v2407_v58, %v683_v46  ;;  %v771_v50 = vmax.f32 %v681_v43, 0.0 }
 0x1e2   : > { %v774_v49 = vmax.f32 %v692_v45, 0.0 }
 0x1e3   : > { %v772_v51 = vmax.f32 %v684_v47, 0.0  ;;  %v2178_v47 = vld [vmem:[%s2655_s2 + $0xb8] sm:$0xff]  }
 0x1e4   : > { %v798_v0 = vpack.c.bf16 %v774_v49, %v773_v48  ;;  %2059 = vmatprep.subr.bf16.mxu1 %v2178_v47  ;;  %v2179_v48 = vld [vmem:[%s2655_s2 + $0xc0] sm:$0xff]   ;;  %v2181_v49 = vld [vmem:[%s2655_s2 + $0xd0] sm:$0xff]  }
 0x1e5   : > { %v797_v38 = vpack.c.bf16 %v772_v51, %v771_v50  ;;  %v1983_v35 = vpop.f32.mrb[32].mxu1  ;;  %2060 = vmatpush3.bf16.msra.mxu1 %v2178_v47  ;;  %2093 = vmatprep.subr.bf16.mxu0 %v2179_v48  ;;  %v2182_v50 = vld [vmem:[%s2655_s2 + $0xd8] sm:$0xff]   ;;  %v2183_v51 = vld [vmem:[%s2655_s2 + $0xe0] sm:$0xff]  }
 0x1e6   : > { %v705_v52 = vadd.f32 %v1983_v35, %v2407_v58  ;;  %v696_v53 = vpop.f32.mrb[33].mxu1  ;;  %2094 = vmatpush3.bf16.msra.mxu0 %v2179_v48  ;;  %v2468_v35 = vld [vmem:[%s2656_s3 + $0x10] ss:$0 sm:$0xff] }
 0x1e7   : > { %v697_v54 = vadd.f32 %v2407_v58, %v696_v53  ;;  %v1984_v55 = vpop.f32.mrb[34].mxu1  ;;  %2025 = vmatprep.mubr.bf16.mxu0 %v797_v38  ;;  %v2185_v38 = vld [vmem:[%s2655_s2 + $0xf0] sm:$0xff]  }
 0x1e8   : > { %v708_v56 = vadd.f32 %v1984_v55, %v2407_v58  ;;  %v699_v57 = vpop.f32.mrb[35].mxu1  ;;  %2026 = vmatmul.mubr.bf16.gmra.mrb[28].mxu0 %v798_v0  ;;  %v777_v60 = vmax.f32 %v705_v52, 0.0  ;;  %v2184_v0 = vld [vmem:[%s2655_s2 + $0xe8] sm:$0xff]  }
 0x1e9   : > { %v700_v59 = vadd.f32 %v2407_v58, %v699_v57  ;;  %v775_v62 = vmax.f32 %v697_v54, 0.0 }
 0x1ea   : > { %v778_v61 = vmax.f32 %v708_v56, 0.0 }
 0x1eb   : > { %v776_v63 = vmax.f32 %v700_v59, 0.0 }
 0x1ec   : > { %v800_v1 = vpack.c.bf16 %v778_v61, %v777_v60 }
 0x1ed   : > { %v799_v2 = vpack.c.bf16 %v776_v63, %v775_v62  ;;  %v1987_v3 = vpop.f32.mrb[36].mxu1 }
 0x1ee   : > { %v721_v4 = vadd.f32 %v1987_v3, %v2407_v58  ;;  %v712_v5 = vpop.f32.mrb[37].mxu1 }
 0x1ef   : > { %v713_v6 = vadd.f32 %v2407_v58, %v712_v5  ;;  %v1988_v7 = vpop.f32.mrb[38].mxu1  ;;  %2029 = vmatprep.mubr.bf16.mxu0 %v799_v2 }
 0x1f0   : > { %v724_v8 = vadd.f32 %v1988_v7, %v2407_v58  ;;  %v715_v9 = vpop.f32.mrb[39].mxu1  ;;  %2030 = vmatmul.mubr.bf16.gmra.mrb[32].mxu0 %v800_v1  ;;  %v781_v11 = vmax.f32 %v721_v4, 0.0 }
 0x1f1   : > { %v716_v10 = vadd.f32 %v2407_v58, %v715_v9  ;;  %v779_v13 = vmax.f32 %v713_v6, 0.0 }
 0x1f2   : > { %v782_v12 = vmax.f32 %v724_v8, 0.0 }
 0x1f3   : > { %v780_v14 = vmax.f32 %v716_v10, 0.0 }
 0x1f4   : > { %v802_v15 = vpack.c.bf16 %v782_v12, %v781_v11 }
 0x1f5   : > { %v801_v16 = vpack.c.bf16 %v780_v14, %v779_v13  ;;  %v1991_v17 = vpop.f32.mrb[40].mxu1 }
 0x1f6   : > { %v737_v18 = vadd.f32 %v1991_v17, %v2407_v58  ;;  %v728_v19 = vpop.f32.mrb[41].mxu1 }
 0x1f7   : > { %v729_v20 = vadd.f32 %v2407_v58, %v728_v19  ;;  %v1992_v21 = vpop.f32.mrb[42].mxu1  ;;  %2033 = vmatprep.mubr.bf16.mxu0 %v801_v16 }
 0x1f8   : > { %v740_v22 = vadd.f32 %v1992_v21, %v2407_v58  ;;  %v731_v23 = vpop.f32.mrb[43].mxu1  ;;  %2034 = vmatmul.mubr.bf16.gmra.mrb[36].mxu0 %v802_v15  ;;  %v785_v25 = vmax.f32 %v737_v18, 0.0 }
 0x1f9   : > { %v732_v24 = vadd.f32 %v2407_v58, %v731_v23  ;;  %v783_v27 = vmax.f32 %v729_v20, 0.0 }
 0x1fa   : > { %v786_v26 = vmax.f32 %v740_v22, 0.0 }
 0x1fb   : > { %v784_v28 = vmax.f32 %v732_v24, 0.0 }
 0x1fc   : > { %v804_v29 = vpack.c.bf16 %v786_v26, %v785_v25 }
 0x1fd   : > { %v803_v30 = vpack.c.bf16 %v784_v28, %v783_v27  ;;  %v1995_v31 = vpop.f32.mrb[44].mxu1 }
 0x1fe   : > { %v753_v32 = vadd.f32 %v1995_v31, %v2407_v58  ;;  %v744_v33 = vpop.f32.mrb[45].mxu1 }
 0x1ff   : > { %v745_v34 = vadd.f32 %v2407_v58, %v744_v33  ;;  %v1996_v36 = vpop.f32.mrb[46].mxu1  ;;  %2037 = vmatprep.mubr.bf16.mxu0 %v803_v30 }
 0x200   : > { %v756_v37 = vadd.f32 %v1996_v36, %v2407_v58  ;;  %v747_v39 = vpop.f32.mrb[47].mxu1  ;;  %2038 = vmatmul.mubr.bf16.gmra.mrb[40].mxu0 %v804_v29  ;;  %v789_v41 = vmax.f32 %v753_v32, 0.0 }
 0x201   : > { %v748_v40 = vadd.f32 %v2407_v58, %v747_v39  ;;  %v787_v43 = vmax.f32 %v745_v34, 0.0  ;;  %v2180_v58 = vld [vmem:[%s2655_s2 + $0xc8] sm:$0xff]  }
 0x202   : > { %v790_v42 = vmax.f32 %v756_v37, 0.0  ;;  %2095 = vmatprep.subr.bf16.mxu0 %v2180_v58 }
 0x203   : > { %v788_v44 = vmax.f32 %v748_v40, 0.0  ;;  %2096 = vmatpush3.bf16.msra.mxu0 %v2180_v58 }
 0x204   : > { %v806_v45 = vpack.c.bf16 %v790_v42, %v789_v41  ;;  %2097 = vmatprep.subr.bf16.mxu0 %v2181_v49 }
 0x205   : > { %v805_v46 = vpack.c.bf16 %v788_v44, %v787_v43 }
 0x207   : > { %2041 = vmatprep.mubr.bf16.mxu0 %v805_v46  ;;  %2098 = vmatpush3.bf16.msra.mxu0 %v2181_v49 }
 0x208   : > { %2042 = vmatmul.mubr.bf16.gmra.mrb[44].mxu0 %v806_v45  ;;  %2099 = vmatprep.subr.bf16.mxu0 %v2182_v50 }
 0x20b   : > { %2100 = vmatpush3.bf16.msra.mxu0 %v2182_v50 }
 0x20c   : > { %2101 = vmatprep.subr.bf16.mxu0 %v2183_v51 }
 0x20f   : > { %2102 = vmatpush3.bf16.msra.mxu0 %v2183_v51 }
 0x210   : > { %2103 = vmatprep.subr.bf16.mxu0 %v2184_v0 }
 0x213   : > { %2104 = vmatpush3.bf16.msra.mxu0 %v2184_v0 }
 0x214   : > { %2105 = vmatprep.subr.bf16.mxu0 %v2185_v38 }
 0x217   : > { %2106 = vmatpush3.bf16.msra.mxu0 %v2185_v38 }
 0x2a3   : > { %v2015_v52 = vpop.f32.mrb[16].mxu0 }
 0x2a4   : > { %v920_v53 = vadd.f32 %v2015_v52, %v2468_v35  ;;  %v911_v54 = vpop.f32.mrb[17].mxu0 }
 0x2a5   : > { %v912_v55 = vadd.f32 %v2468_v35, %v911_v54  ;;  %v2016_v56 = vpop.f32.mrb[18].mxu0 }
 0x2a6   : > { %v923_v57 = vadd.f32 %v2016_v56, %v2468_v35  ;;  %v914_v59 = vpop.f32.mrb[19].mxu0  ;;  %v1040_v61 = vmax.f32 %v920_v53, 0.0 }
 0x2a7   : > { %v915_v60 = vadd.f32 %v2468_v35, %v914_v59  ;;  %v1038_v63 = vmax.f32 %v912_v55, 0.0 }
 0x2a8   : > { %v1041_v62 = vmax.f32 %v923_v57, 0.0 }
 0x2a9   : > { %v1039_v1 = vmax.f32 %v915_v60, 0.0 }
 0x2aa   : > { %v1071_v2 = vpack.c.bf16 %v1041_v62, %v1040_v61 }
 0x2ab   : > { %v1070_v3 = vpack.c.bf16 %v1039_v1, %v1038_v63  ;;  %v2019_v4 = vpop.f32.mrb[20].mxu0 }
 0x2ac   : > { %v936_v5 = vadd.f32 %v2019_v4, %v2468_v35  ;;  %v927_v6 = vpop.f32.mrb[21].mxu0 }
 0x2ad   : > { %v928_v7 = vadd.f32 %v2468_v35, %v927_v6  ;;  %v2020_v8 = vpop.f32.mrb[22].mxu0  ;;  %2061 = vmatprep.mubr.bf16.mxu1 %v1070_v3 }
 0x2ae   : > { %v939_v9 = vadd.f32 %v2020_v8, %v2468_v35  ;;  %v930_v10 = vpop.f32.mrb[23].mxu0  ;;  %2062 = vmatmul.mubr.bf16.vlgmr.msra.gmra.mrb[48].mxu1 %v1071_v2  ;;  %v1044_v12 = vmax.f32 %v936_v5, 0.0 }
 0x2af   : > { %v931_v11 = vadd.f32 %v2468_v35, %v930_v10  ;;  %v1042_v14 = vmax.f32 %v928_v7, 0.0 }
 0x2b0   : > { %v1045_v13 = vmax.f32 %v939_v9, 0.0 }
 0x2b1   : > { %v1043_v15 = vmax.f32 %v931_v11, 0.0 }
 0x2b2   : > { %v1073_v16 = vpack.c.bf16 %v1045_v13, %v1044_v12 }
 0x2b3   : > { %v1072_v17 = vpack.c.bf16 %v1043_v15, %v1042_v14  ;;  %v2023_v18 = vpop.f32.mrb[24].mxu0 }
 0x2b4   : > { %v952_v19 = vadd.f32 %v2023_v18, %v2468_v35  ;;  %v943_v20 = vpop.f32.mrb[25].mxu0 }
 0x2b5   : > { %v944_v21 = vadd.f32 %v2468_v35, %v943_v20  ;;  %v2024_v22 = vpop.f32.mrb[26].mxu0  ;;  %2065 = vmatprep.mubr.bf16.mxu1 %v1072_v17 }
 0x2b6   : > { %v955_v23 = vadd.f32 %v2024_v22, %v2468_v35  ;;  %v946_v24 = vpop.f32.mrb[27].mxu0  ;;  %2066 = vmatmul.mubr.bf16.gmra.mrb[52].mxu1 %v1073_v16  ;;  %v1048_v26 = vmax.f32 %v952_v19, 0.0 }
 0x2b7   : > { %v947_v25 = vadd.f32 %v2468_v35, %v946_v24  ;;  %v1046_v28 = vmax.f32 %v944_v21, 0.0 }
 0x2b8   : > { %v1049_v27 = vmax.f32 %v955_v23, 0.0 }
 0x2b9   : > { %v1047_v29 = vmax.f32 %v947_v25, 0.0 }
 0x2ba   : > { %v1075_v30 = vpack.c.bf16 %v1049_v27, %v1048_v26 }
 0x2bb   : > { %v1074_v31 = vpack.c.bf16 %v1047_v29, %v1046_v28  ;;  %v2027_v32 = vpop.f32.mrb[28].mxu0 }
 0x2bc   : > { %v968_v33 = vadd.f32 %v2027_v32, %v2468_v35  ;;  %v959_v34 = vpop.f32.mrb[29].mxu0 }
 0x2bd   : > { %v960_v36 = vadd.f32 %v2468_v35, %v959_v34  ;;  %v2028_v37 = vpop.f32.mrb[30].mxu0  ;;  %2069 = vmatprep.mubr.bf16.mxu1 %v1074_v31 }
 0x2be   : > { %v971_v39 = vadd.f32 %v2028_v37, %v2468_v35  ;;  %v962_v40 = vpop.f32.mrb[31].mxu0  ;;  %2070 = vmatmul.mubr.bf16.gmra.mrb[56].mxu1 %v1075_v30  ;;  %v1052_v42 = vmax.f32 %v968_v33, 0.0 }
 0x2bf   : > { %v963_v41 = vadd.f32 %v2468_v35, %v962_v40  ;;  %v1050_v44 = vmax.f32 %v960_v36, 0.0 }
 0x2c0   : > { %v1053_v43 = vmax.f32 %v971_v39, 0.0 }
 0x2c1   : > { %v1051_v45 = vmax.f32 %v963_v41, 0.0  ;;  %v2186_v41 = vld [vmem:[%s2655_s2 + $0xf8] sm:$0xff]  }
 0x2c2   : > { %v1077_v46 = vpack.c.bf16 %v1053_v43, %v1052_v42  ;;  %2107 = vmatprep.subr.bf16.mxu0 %v2186_v41  ;;  %v2508_v42 = vld [vmem:[%s2656_s3 + $0x18] ss:$0 sm:$0xff] }
 0x2c3   : > { %v1076_v47 = vpack.c.bf16 %v1051_v45, %v1050_v44  ;;  %v2031_v48 = vpop.f32.mrb[32].mxu0  ;;  %2108 = vmatpush3.bf16.msra.mxu0 %v2186_v41 }
 0x2c4   : > { %v984_v58 = vadd.f32 %v2031_v48, %v2468_v35  ;;  %v975_v49 = vpop.f32.mrb[33].mxu0 }
 0x2c5   : > { %v976_v50 = vadd.f32 %v2468_v35, %v975_v49  ;;  %v2032_v51 = vpop.f32.mrb[34].mxu0  ;;  %2073 = vmatprep.mubr.bf16.mxu1 %v1076_v47 }
 0x2c6   : > { %v987_v0 = vadd.f32 %v2032_v51, %v2468_v35  ;;  %v978_v38 = vpop.f32.mrb[35].mxu0  ;;  %2074 = vmatmul.mubr.bf16.gmra.mrb[60].mxu1 %v1077_v46  ;;  %v1056_v53 = vmax.f32 %v984_v58, 0.0 }
 0x2c7   : > { %v979_v52 = vadd.f32 %v2468_v35, %v978_v38  ;;  %v1054_v55 = vmax.f32 %v976_v50, 0.0 }
 0x2c8   : > { %v1057_v54 = vmax.f32 %v987_v0, 0.0 }
 0x2c9   : > { %v1055_v56 = vmax.f32 %v979_v52, 0.0 }
 0x2ca   : > { %v1079_v57 = vpack.c.bf16 %v1057_v54, %v1056_v53 }
 0x2cb   : > { %v1078_v59 = vpack.c.bf16 %v1055_v56, %v1054_v55  ;;  %v2035_v60 = vpop.f32.mrb[36].mxu0 }
 0x2cc   : > { %v1000_v61 = vadd.f32 %v2035_v60, %v2468_v35  ;;  %v991_v62 = vpop.f32.mrb[37].mxu0 }
 0x2cd   : > { %v992_v63 = vadd.f32 %v2468_v35, %v991_v62  ;;  %v2036_v1 = vpop.f32.mrb[38].mxu0  ;;  %2077 = vmatprep.mubr.bf16.mxu1 %v1078_v59 }
 0x2ce   : > { %v1003_v2 = vadd.f32 %v2036_v1, %v2468_v35  ;;  %v994_v3 = vpop.f32.mrb[39].mxu0  ;;  %2078 = vmatmul.mubr.bf16.gmra.mrb[64].mxu1 %v1079_v57  ;;  %v1060_v5 = vmax.f32 %v1000_v61, 0.0 }
 0x2cf   : > { %v995_v4 = vadd.f32 %v2468_v35, %v994_v3  ;;  %v1058_v7 = vmax.f32 %v992_v63, 0.0 }
 0x2d0   : > { %v1061_v6 = vmax.f32 %v1003_v2, 0.0 }
 0x2d1   : > { %v1059_v8 = vmax.f32 %v995_v4, 0.0 }
 0x2d2   : > { %v1081_v9 = vpack.c.bf16 %v1061_v6, %v1060_v5 }
 0x2d3   : > { %v1080_v10 = vpack.c.bf16 %v1059_v8, %v1058_v7  ;;  %v2039_v11 = vpop.f32.mrb[40].mxu0 }
 0x2d4   : > { %v1016_v12 = vadd.f32 %v2039_v11, %v2468_v35  ;;  %v1007_v13 = vpop.f32.mrb[41].mxu0 }
 0x2d5   : > { %v1008_v14 = vadd.f32 %v2468_v35, %v1007_v13  ;;  %v2040_v15 = vpop.f32.mrb[42].mxu0  ;;  %2081 = vmatprep.mubr.bf16.mxu1 %v1080_v10 }
 0x2d6   : > { %v1019_v16 = vadd.f32 %v2040_v15, %v2468_v35  ;;  %v1010_v17 = vpop.f32.mrb[43].mxu0  ;;  %2082 = vmatmul.mubr.bf16.gmra.mrb[68].mxu1 %v1081_v9  ;;  %v1064_v19 = vmax.f32 %v1016_v12, 0.0 }
 0x2d7   : > { %v1011_v18 = vadd.f32 %v2468_v35, %v1010_v17  ;;  %v1062_v21 = vmax.f32 %v1008_v14, 0.0 }
 0x2d8   : > { %v1065_v20 = vmax.f32 %v1019_v16, 0.0 }
 0x2d9   : > { %v1063_v22 = vmax.f32 %v1011_v18, 0.0 }
 0x2da   : > { %v1083_v23 = vpack.c.bf16 %v1065_v20, %v1064_v19 }
 0x2db   : > { %v1082_v24 = vpack.c.bf16 %v1063_v22, %v1062_v21  ;;  %v2043_v25 = vpop.f32.mrb[44].mxu0 }
 0x2dc   : > { %v1032_v26 = vadd.f32 %v2043_v25, %v2468_v35  ;;  %v1023_v27 = vpop.f32.mrb[45].mxu0 }
 0x2dd   : > { %v1024_v28 = vadd.f32 %v2468_v35, %v1023_v27  ;;  %v2044_v29 = vpop.f32.mrb[46].mxu0  ;;  %2085 = vmatprep.mubr.bf16.mxu1 %v1082_v24 }
 0x2de   : > { %v1035_v30 = vadd.f32 %v2044_v29, %v2468_v35  ;;  %v1026_v31 = vpop.f32.mrb[47].mxu0  ;;  %2086 = vmatmul.mubr.bf16.gmra.mrb[72].mxu1 %v1083_v23  ;;  %v1068_v33 = vmax.f32 %v1032_v26, 0.0 }
 0x2df   : > { %v1027_v32 = vadd.f32 %v2468_v35, %v1026_v31  ;;  %v1066_v36 = vmax.f32 %v1024_v28, 0.0 }
 0x2e0   : > { %v1069_v34 = vmax.f32 %v1035_v30, 0.0 }
 0x2e1   : > { %v1067_v37 = vmax.f32 %v1027_v32, 0.0 }
 0x2e2   : > { %v1085_v39 = vpack.c.bf16 %v1069_v34, %v1068_v33 }
 0x2e3   : > { %v1084_v40 = vpack.c.bf16 %v1067_v37, %v1066_v36 }
 0x2e5   : > { %2089 = vmatprep.mubr.bf16.mxu1 %v1084_v40 }
 0x2e6   : > { %2090 = vmatmul.mubr.bf16.gmra.mrb[76].mxu1 %v1085_v39 }
 0x381   : > { %v2063_v35 = vpop.f32.mrb[48].mxu1 }
 0x382   : > { %v1199_v43 = vadd.f32 %v2063_v35, %v2508_v42  ;;  %v1190_v44 = vpop.f32.mrb[49].mxu1 }
 0x383   : > { %v1191_v45 = vadd.f32 %v2508_v42, %v1190_v44  ;;  %v2064_v46 = vpop.f32.mrb[50].mxu1 }
 0x384   : > { %v1202_v47 = vadd.f32 %v2064_v46, %v2508_v42  ;;  %v1193_v48 = vpop.f32.mrb[51].mxu1  ;;  %v1319_v49 = vmax.f32 %v1199_v43, 0.0 }
 0x385   : > { %v1194_v58 = vadd.f32 %v2508_v42, %v1193_v48  ;;  %v1317_v51 = vmax.f32 %v1191_v45, 0.0 }
 0x386   : > { %v1320_v50 = vmax.f32 %v1202_v47, 0.0 }
 0x387   : > { %v1318_v0 = vmax.f32 %v1194_v58, 0.0 }
 0x388   : > { %v1350_v38 = vpack.c.bf16 %v1320_v50, %v1319_v49 }
 0x389   : > { %v1349_v52 = vpack.c.bf16 %v1318_v0, %v1317_v51  ;;  %v2067_v53 = vpop.f32.mrb[52].mxu1 }
 0x38a   : > { %v1215_v54 = vadd.f32 %v2067_v53, %v2508_v42  ;;  %v1206_v55 = vpop.f32.mrb[53].mxu1 }
 0x38b   : > { %v1207_v56 = vadd.f32 %v2508_v42, %v1206_v55  ;;  %v2068_v57 = vpop.f32.mrb[54].mxu1  ;;  %2109 = vmatprep.mubr.bf16.mxu0 %v1349_v52 }
 0x38c   : > { %v1218_v59 = vadd.f32 %v2068_v57, %v2508_v42  ;;  %v1209_v60 = vpop.f32.mrb[55].mxu1  ;;  %2110 = vmatmul.mubr.bf16.vlgmr.msra.gmra.mrb[48].mxu0 %v1350_v38  ;;  %v1323_v62 = vmax.f32 %v1215_v54, 0.0 }
 0x38d   : > { %v1210_v61 = vadd.f32 %v2508_v42, %v1209_v60  ;;  %v1321_v1 = vmax.f32 %v1207_v56, 0.0 }
 0x38e   : > { %v1324_v63 = vmax.f32 %v1218_v59, 0.0 }
 0x38f   : > { %v1322_v2 = vmax.f32 %v1210_v61, 0.0 }
 0x390   : > { %v1352_v3 = vpack.c.bf16 %v1324_v63, %v1323_v62 }
 0x391   : > { %v1351_v4 = vpack.c.bf16 %v1322_v2, %v1321_v1  ;;  %v2071_v5 = vpop.f32.mrb[56].mxu1 }
 0x392   : > { %v1231_v6 = vadd.f32 %v2071_v5, %v2508_v42  ;;  %v1222_v7 = vpop.f32.mrb[57].mxu1 }
 0x393   : > { %v1223_v8 = vadd.f32 %v2508_v42, %v1222_v7  ;;  %v2072_v9 = vpop.f32.mrb[58].mxu1  ;;  %2113 = vmatprep.mubr.bf16.mxu0 %v1351_v4 }
 0x394   : > { %v1234_v10 = vadd.f32 %v2072_v9, %v2508_v42  ;;  %v1225_v11 = vpop.f32.mrb[59].mxu1  ;;  %2114 = vmatmul.mubr.bf16.gmra.mrb[52].mxu0 %v1352_v3  ;;  %v1327_v13 = vmax.f32 %v1231_v6, 0.0 }
 0x395   : > { %v1226_v12 = vadd.f32 %v2508_v42, %v1225_v11  ;;  %v1325_v15 = vmax.f32 %v1223_v8, 0.0 }
 0x396   : > { %v1328_v14 = vmax.f32 %v1234_v10, 0.0 }
 0x397   : > { %v1326_v16 = vmax.f32 %v1226_v12, 0.0 }
 0x398   : > { %v1354_v17 = vpack.c.bf16 %v1328_v14, %v1327_v13 }
 0x399   : > { %v1353_v18 = vpack.c.bf16 %v1326_v16, %v1325_v15  ;;  %v2075_v19 = vpop.f32.mrb[60].mxu1 }
 0x39a   : > { %v1247_v20 = vadd.f32 %v2075_v19, %v2508_v42  ;;  %v1238_v21 = vpop.f32.mrb[61].mxu1 }
 0x39b   : > { %v1239_v22 = vadd.f32 %v2508_v42, %v1238_v21  ;;  %v2076_v23 = vpop.f32.mrb[62].mxu1  ;;  %2117 = vmatprep.mubr.bf16.mxu0 %v1353_v18 }
 0x39c   : > { %v1250_v24 = vadd.f32 %v2076_v23, %v2508_v42  ;;  %v1241_v25 = vpop.f32.mrb[63].mxu1  ;;  %2118 = vmatmul.mubr.bf16.gmra.mrb[56].mxu0 %v1354_v17  ;;  %v1331_v27 = vmax.f32 %v1247_v20, 0.0 }
 0x39d   : > { %v1242_v26 = vadd.f32 %v2508_v42, %v1241_v25  ;;  %v1329_v29 = vmax.f32 %v1239_v22, 0.0 }
 0x39e   : > { %v1332_v28 = vmax.f32 %v1250_v24, 0.0 }
 0x39f   : > { %v1330_v30 = vmax.f32 %v1242_v26, 0.0  ;;  %v2545_v26 = vld [vmem:[%s2656_s3 + $0x20] ss:$0 sm:$0xff] }
 0x3a0   : > { %v1356_v31 = vpack.c.bf16 %v1332_v28, %v1331_v27 }
 0x3a1   : > { %v1355_v32 = vpack.c.bf16 %v1330_v30, %v1329_v29  ;;  %v2079_v33 = vpop.f32.mrb[64].mxu1 }
 0x3a2   : > { %v1263_v34 = vadd.f32 %v2079_v33, %v2508_v42  ;;  %v1254_v36 = vpop.f32.mrb[65].mxu1 }
 0x3a3   : > { %v1255_v37 = vadd.f32 %v2508_v42, %v1254_v36  ;;  %v2080_v39 = vpop.f32.mrb[66].mxu1  ;;  %2121 = vmatprep.mubr.bf16.mxu0 %v1355_v32 }
 0x3a4   : > { %v1266_v40 = vadd.f32 %v2080_v39, %v2508_v42  ;;  %v1257_v41 = vpop.f32.mrb[67].mxu1  ;;  %2122 = vmatmul.mubr.bf16.gmra.mrb[60].mxu0 %v1356_v31  ;;  %v1335_v43 = vmax.f32 %v1263_v34, 0.0 }
 0x3a5   : > { %v1258_v35 = vadd.f32 %v2508_v42, %v1257_v41  ;;  %v1333_v45 = vmax.f32 %v1255_v37, 0.0 }
 0x3a6   : > { %v1336_v44 = vmax.f32 %v1266_v40, 0.0 }
 0x3a7   : > { %v1334_v46 = vmax.f32 %v1258_v35, 0.0 }
 0x3a8   : > { %v1358_v47 = vpack.c.bf16 %v1336_v44, %v1335_v43 }
 0x3a9   : > { %v1357_v48 = vpack.c.bf16 %v1334_v46, %v1333_v45  ;;  %v2083_v58 = vpop.f32.mrb[68].mxu1 }
 0x3aa   : > { %v1279_v49 = vadd.f32 %v2083_v58, %v2508_v42  ;;  %v1270_v50 = vpop.f32.mrb[69].mxu1 }
 0x3ab   : > { %v1271_v51 = vadd.f32 %v2508_v42, %v1270_v50  ;;  %v2084_v0 = vpop.f32.mrb[70].mxu1  ;;  %2125 = vmatprep.mubr.bf16.mxu0 %v1357_v48 }
 0x3ac   : > { %v1282_v38 = vadd.f32 %v2084_v0, %v2508_v42  ;;  %v1273_v52 = vpop.f32.mrb[71].mxu1  ;;  %2126 = vmatmul.mubr.bf16.gmra.mrb[64].mxu0 %v1358_v47  ;;  %v1339_v54 = vmax.f32 %v1279_v49, 0.0 }
 0x3ad   : > { %v1274_v53 = vadd.f32 %v2508_v42, %v1273_v52  ;;  %v1337_v56 = vmax.f32 %v1271_v51, 0.0 }
 0x3ae   : > { %v1340_v55 = vmax.f32 %v1282_v38, 0.0 }
 0x3af   : > { %v1338_v57 = vmax.f32 %v1274_v53, 0.0 }
 0x3b0   : > { %v1360_v59 = vpack.c.bf16 %v1340_v55, %v1339_v54 }
 0x3b1   : > { %v1359_v60 = vpack.c.bf16 %v1338_v57, %v1337_v56  ;;  %v2087_v61 = vpop.f32.mrb[72].mxu1 }
 0x3b2   : > { %v1295_v62 = vadd.f32 %v2087_v61, %v2508_v42  ;;  %v1286_v63 = vpop.f32.mrb[73].mxu1 }
 0x3b3   : > { %v1287_v1 = vadd.f32 %v2508_v42, %v1286_v63  ;;  %v2088_v2 = vpop.f32.mrb[74].mxu1  ;;  %2129 = vmatprep.mubr.bf16.mxu0 %v1359_v60 }
 0x3b4   : > { %v1298_v3 = vadd.f32 %v2088_v2, %v2508_v42  ;;  %v1289_v4 = vpop.f32.mrb[75].mxu1  ;;  %2130 = vmatmul.mubr.bf16.gmra.mrb[68].mxu0 %v1360_v59  ;;  %v1343_v6 = vmax.f32 %v1295_v62, 0.0 }
 0x3b5   : > { %v1290_v5 = vadd.f32 %v2508_v42, %v1289_v4  ;;  %v1341_v8 = vmax.f32 %v1287_v1, 0.0 }
 0x3b6   : > { %v1344_v7 = vmax.f32 %v1298_v3, 0.0 }
 0x3b7   : > { %v1342_v9 = vmax.f32 %v1290_v5, 0.0 }
 0x3b8   : > { %v1362_v10 = vpack.c.bf16 %v1344_v7, %v1343_v6 }
 0x3b9   : > { %v1361_v11 = vpack.c.bf16 %v1342_v9, %v1341_v8  ;;  %v2091_v12 = vpop.f32.mrb[76].mxu1 }
 0x3ba   : > { %v1311_v13 = vadd.f32 %v2091_v12, %v2508_v42  ;;  %v1302_v14 = vpop.f32.mrb[77].mxu1 }
 0x3bb   : > { %v1303_v15 = vadd.f32 %v2508_v42, %v1302_v14  ;;  %v2092_v16 = vpop.f32.mrb[78].mxu1  ;;  %2133 = vmatprep.mubr.bf16.mxu0 %v1361_v11 }
 0x3bc   : > { %v1314_v17 = vadd.f32 %v2092_v16, %v2508_v42  ;;  %v1305_v18 = vpop.f32.mrb[79].mxu1  ;;  %2134 = vmatmul.mubr.bf16.gmra.mrb[72].mxu0 %v1362_v10  ;;  %v1347_v20 = vmax.f32 %v1311_v13, 0.0 }
 0x3bd   : > { %v1306_v19 = vadd.f32 %v2508_v42, %v1305_v18  ;;  %v1345_v22 = vmax.f32 %v1303_v15, 0.0 }
 0x3be   : > { %v1348_v21 = vmax.f32 %v1314_v17, 0.0 }
 0x3bf   : > { %v1346_v23 = vmax.f32 %v1306_v19, 0.0 }
 0x3c0   : > { %v1364_v24 = vpack.c.bf16 %v1348_v21, %v1347_v20 }
 0x3c1   : > { %v1363_v25 = vpack.c.bf16 %v1346_v23, %v1345_v22 }
 0x3c3   : > { %2137 = vmatprep.mubr.bf16.mxu0 %v1363_v25 }
 0x3c4   : > { %2138 = vmatmul.mubr.bf16.gmra.mrb[76].mxu0 %v1364_v24 }
 0x45f   : > { %v2111_v42 = vpop.f32.mrb[48].mxu0 }
 0x460   : > { %v1478_v27 = vadd.f32 %v2111_v42, %v2545_v26  ;;  %v1469_v28 = vpop.f32.mrb[49].mxu0 }
 0x461   : > { %v1470_v29 = vadd.f32 %v2545_v26, %v1469_v28  ;;  %v2112_v30 = vpop.f32.mrb[50].mxu0 }
 0x462   : > { %1599 = vst.msk [vmem:[%s2552_s7 + $0x10] sm:$0xff] %vm1596_vm1, %v1478_v27  ;;  %v1481_v31 = vadd.f32 %v2112_v30, %v2545_v26  ;;  %v1472_v32 = vpop.f32.mrb[51].mxu0 }
 0x463   : > { %1597 = vst.msk [vmem:[%s2552_s7] sm:$0xff] %vm1596_vm1, %v1470_v29  ;;  %v1473_v33 = vadd.f32 %v2545_v26, %v1472_v32 }
 0x464   : > { %1600 = vst.msk [vmem:[%s2552_s7 + $0x18] sm:$0xff] %vm1596_vm1, %v1481_v31 }
 0x465   : > { %1598 = vst.msk [vmem:[%s2552_s7 + $0x8] sm:$0xff] %vm1596_vm1, %v1473_v33 }
 0x467   : > { %v2115_v34 = vpop.f32.mrb[52].mxu0 }
 0x468   : > { %v1494_v36 = vadd.f32 %v2115_v34, %v2545_v26  ;;  %v1485_v37 = vpop.f32.mrb[53].mxu0 }
 0x469   : > { %v1486_v39 = vadd.f32 %v2545_v26, %v1485_v37  ;;  %v2116_v40 = vpop.f32.mrb[54].mxu0 }
 0x46a   : > { %1603 = vst.msk [vmem:[%s2552_s7 + $0x30] sm:$0xff] %vm1596_vm1, %v1494_v36  ;;  %v1497_v41 = vadd.f32 %v2116_v40, %v2545_v26  ;;  %v1488_v35 = vpop.f32.mrb[55].mxu0 }
 0x46b   : > { %1601 = vst.msk [vmem:[%s2552_s7 + $0x20] sm:$0xff] %vm1596_vm1, %v1486_v39  ;;  %v1489_v43 = vadd.f32 %v2545_v26, %v1488_v35 }
 0x46c   : > { %1604 = vst.msk [vmem:[%s2552_s7 + $0x38] sm:$0xff] %vm1596_vm1, %v1497_v41 }
 0x46d   : > { %1602 = vst.msk [vmem:[%s2552_s7 + $0x28] sm:$0xff] %vm1596_vm1, %v1489_v43 }
 0x46f   : > { %v2119_v44 = vpop.f32.mrb[56].mxu0 }
 0x470   : > { %v1510_v45 = vadd.f32 %v2119_v44, %v2545_v26  ;;  %v1501_v46 = vpop.f32.mrb[57].mxu0 }
 0x471   : > { %v1502_v47 = vadd.f32 %v2545_v26, %v1501_v46  ;;  %v2120_v48 = vpop.f32.mrb[58].mxu0 }
 0x472   : > { %1607 = vst.msk [vmem:[%s2552_s7 + $0x50] sm:$0xff] %vm1596_vm1, %v1510_v45  ;;  %v1513_v58 = vadd.f32 %v2120_v48, %v2545_v26  ;;  %v1504_v49 = vpop.f32.mrb[59].mxu0 }
 0x473   : > { %1605 = vst.msk [vmem:[%s2552_s7 + $0x40] sm:$0xff] %vm1596_vm1, %v1502_v47  ;;  %v1505_v50 = vadd.f32 %v2545_v26, %v1504_v49 }
 0x474   : > { %1608 = vst.msk [vmem:[%s2552_s7 + $0x58] sm:$0xff] %vm1596_vm1, %v1513_v58 }
 0x475   : > { %1606 = vst.msk [vmem:[%s2552_s7 + $0x48] sm:$0xff] %vm1596_vm1, %v1505_v50 }
 0x477   : > { %v2123_v51 = vpop.f32.mrb[60].mxu0 }
 0x478   : > { %v1526_v0 = vadd.f32 %v2123_v51, %v2545_v26  ;;  %v1517_v38 = vpop.f32.mrb[61].mxu0 }
 0x479   : > { %v1518_v52 = vadd.f32 %v2545_v26, %v1517_v38  ;;  %v2124_v53 = vpop.f32.mrb[62].mxu0 }
 0x47a   : > { %1611 = vst.msk [vmem:[%s2552_s7 + $0x70] sm:$0xff] %vm1596_vm1, %v1526_v0  ;;  %v1529_v54 = vadd.f32 %v2124_v53, %v2545_v26  ;;  %v1520_v55 = vpop.f32.mrb[63].mxu0 }
 0x47b   : > { %1609 = vst.msk [vmem:[%s2552_s7 + $0x60] sm:$0xff] %vm1596_vm1, %v1518_v52  ;;  %v1521_v56 = vadd.f32 %v2545_v26, %v1520_v55 }
 0x47c   : > { %1612 = vst.msk [vmem:[%s2552_s7 + $0x78] sm:$0xff] %vm1596_vm1, %v1529_v54 }
 0x47d   : > { %1610 = vst.msk [vmem:[%s2552_s7 + $0x68] sm:$0xff] %vm1596_vm1, %v1521_v56 }
 0x47f   : > { %v2127_v57 = vpop.f32.mrb[64].mxu0 }
 0x480   : > { %v1542_v59 = vadd.f32 %v2127_v57, %v2545_v26  ;;  %v1533_v60 = vpop.f32.mrb[65].mxu0 }
 0x481   : > { %v1534_v61 = vadd.f32 %v2545_v26, %v1533_v60  ;;  %v2128_v62 = vpop.f32.mrb[66].mxu0 }
 0x482   : > { %1615 = vst.msk [vmem:[%s2552_s7 + $0x90] sm:$0xff] %vm1596_vm1, %v1542_v59  ;;  %v1545_v63 = vadd.f32 %v2128_v62, %v2545_v26  ;;  %v1536_v1 = vpop.f32.mrb[67].mxu0 }
 0x483   : > { %1613 = vst.msk [vmem:[%s2552_s7 + $0x80] sm:$0xff] %vm1596_vm1, %v1534_v61  ;;  %v1537_v2 = vadd.f32 %v2545_v26, %v1536_v1 }
 0x484   : > { %1616 = vst.msk [vmem:[%s2552_s7 + $0x98] sm:$0xff] %vm1596_vm1, %v1545_v63 }
 0x485   : > { %1614 = vst.msk [vmem:[%s2552_s7 + $0x88] sm:$0xff] %vm1596_vm1, %v1537_v2 }
 0x487   : > { %v2131_v3 = vpop.f32.mrb[68].mxu0 }
 0x488   : > { %v1558_v4 = vadd.f32 %v2131_v3, %v2545_v26  ;;  %v1549_v5 = vpop.f32.mrb[69].mxu0 }
 0x489   : > { %v1550_v6 = vadd.f32 %v2545_v26, %v1549_v5  ;;  %v2132_v7 = vpop.f32.mrb[70].mxu0 }
 0x48a   : > { %1619 = vst.msk [vmem:[%s2552_s7 + $0xb0] sm:$0xff] %vm1596_vm1, %v1558_v4  ;;  %v1561_v8 = vadd.f32 %v2132_v7, %v2545_v26  ;;  %v1552_v9 = vpop.f32.mrb[71].mxu0 }
 0x48b   : > { %1617 = vst.msk [vmem:[%s2552_s7 + $0xa0] sm:$0xff] %vm1596_vm1, %v1550_v6  ;;  %v1553_v10 = vadd.f32 %v2545_v26, %v1552_v9 }
 0x48c   : > { %1620 = vst.msk [vmem:[%s2552_s7 + $0xb8] sm:$0xff] %vm1596_vm1, %v1561_v8 }
 0x48d   : > { %1618 = vst.msk [vmem:[%s2552_s7 + $0xa8] sm:$0xff] %vm1596_vm1, %v1553_v10 }
 0x48f   : > { %v2135_v11 = vpop.f32.mrb[72].mxu0 }
 0x490   : > { %v1574_v12 = vadd.f32 %v2135_v11, %v2545_v26  ;;  %v1565_v13 = vpop.f32.mrb[73].mxu0 }
 0x491   : > { %v1566_v14 = vadd.f32 %v2545_v26, %v1565_v13  ;;  %v2136_v15 = vpop.f32.mrb[74].mxu0 }
 0x492   : > { %1623 = vst.msk [vmem:[%s2552_s7 + $0xd0] sm:$0xff] %vm1596_vm1, %v1574_v12  ;;  %v1577_v16 = vadd.f32 %v2136_v15, %v2545_v26  ;;  %v1568_v17 = vpop.f32.mrb[75].mxu0 }
 0x493   : > { %1621 = vst.msk [vmem:[%s2552_s7 + $0xc0] sm:$0xff] %vm1596_vm1, %v1566_v14  ;;  %v1569_v18 = vadd.f32 %v2545_v26, %v1568_v17 }
 0x494   : > { %1624 = vst.msk [vmem:[%s2552_s7 + $0xd8] sm:$0xff] %vm1596_vm1, %v1577_v16 }
 0x495   : > { %1622 = vst.msk [vmem:[%s2552_s7 + $0xc8] sm:$0xff] %vm1596_vm1, %v1569_v18 }
 0x497   : > { %v2139_v19 = vpop.f32.mrb[76].mxu0 }
 0x498   : > { %v1590_v20 = vadd.f32 %v2139_v19, %v2545_v26  ;;  %v1581_v21 = vpop.f32.mrb[77].mxu0 }
 0x499   : > { %v1582_v22 = vadd.f32 %v2545_v26, %v1581_v21  ;;  %v2140_v23 = vpop.f32.mrb[78].mxu0 }
 0x49a   : > { %1627 = vst.msk [vmem:[%s2552_s7 + $0xf0] sm:$0xff] %vm1596_vm1, %v1590_v20  ;;  %v1593_v24 = vadd.f32 %v2140_v23, %v2545_v26  ;;  %v1584_v25 = vpop.f32.mrb[79].mxu0 }
 0x49b   : > { %1625 = vst.msk [vmem:[%s2552_s7 + $0xe0] sm:$0xff] %vm1596_vm1, %v1582_v22  ;;  %v1585_v42 = vadd.f32 %v2545_v26, %v1584_v25 }
 0x49c   : > { %1628 = vst.msk [vmem:[%s2552_s7 + $0xf8] sm:$0xff] %vm1596_vm1, %v1593_v24 }
 0x49d   : > { %1626 = vst.msk [vmem:[%s2552_s7 + $0xe8] sm:$0xff] %vm1596_vm1, %v1585_v42 }
 0x49e PF: > { %s14_s15 = sadd.s32 1, %s2193_s15  }
 0x49f   : > { %p11_p4 = scmp.ge.s32.totalorder %s14_s15, 4  }
 0x4a1   :  { %13 = sbr.rel (!%p11_p4) target bundleno = 1 (0x1), region = 69 }

</bundles_post_ra>
